<compile_context>
chip_gen: v6e
topology: v6e:2x2x1
jax: 0.10.0
libtpu: 0.0.40
codegen_flags: <defaults>
</compile_context>

<pallas_src>
import functools

import jax
import jax.numpy as jnp
from jax import lax
from jax.experimental import pallas as pl
from jax.experimental.pallas import tpu as pltpu

CORLOR_CNT = 167  # vocab / out_dim (matches the PyTorch module)


def _round_up(n, m):
    return ((n + m - 1) // m) * m


# ----------------------------- Pallas kernel ------------------------------ #
def _pixel_rnn_kernel(x_ref, wih_ref, whh_ref, bias_ref, wc_ref, bc_ref,
                      out_ref, gx_sc, h_all_sc, *, seq_len, batch, hid):
    """Whole sequence in one kernel invocation (packed-gate layout).

    x_ref    : (S*B, H)    bf16 embedded input, time-major, flattened
    wih_ref  : (H, 4H)     bf16 W_ih^T, gates packed i|f|g|o (PyTorch order)
    whh_ref  : (H, 4H)     bf16 W_hh^T, gates packed i|f|g|o
    bias_ref : (1, 4H)     f32  b_ih + b_hh, packed
    wc_ref   : (H, Cp)     bf16 classifier W^T (lane-padded 167 -> 256)
    bc_ref   : (1, Cp)     f32  classifier bias (lane-padded)
    out_ref  : (S*B, Cp)   f32  logits (lane-dense, padded)
    gx_sc    : (S*B, 4H)   f32  VMEM scratch: precomputed input-gate projections
    h_all_sc : (S*B, H)    f32  VMEM scratch: all hidden states for the classifier
    """
    H = hid
    G = 4 * H  # 128: the packed gate block is exactly one lane block

    # Phase 1: input projection for ALL timesteps as one batched MXU matmul
    # (bf16 operands, f32 accumulation), bias fused.
    gx_sc[...] = (jnp.dot(x_ref[...], wih_ref[...],
                          preferred_element_type=jnp.float32)
                  + bias_ref[...])

    # Lane mask selecting the g-gate slot (tanh) vs i/f/o slots (sigmoid).
    # Hoisted out of the loop (constant; JAX does not CSE broadcasts in loops).
    lane = lax.broadcasted_iota(jnp.int32, (batch, G), 1)
    is_g_slot = (lane >= 2 * H) & (lane < 3 * H)

    # Phase 2: sequential recurrence — only h @ W_hh^T is on the serial path,
    # and with packed gates it is a single (B, H) x (H, 4H) MXU tile per step.
    def step(t, carry):
        h, c = carry                                   # (B, H) f32
        row = pl.multiple_of(t * batch, batch)
        gates = gx_sc[pl.ds(row, batch), :] + jnp.dot(
            h.astype(jnp.bfloat16), whh_ref[...],
            preferred_element_type=jnp.float32)        # (B, 4H) f32
        # One sigmoid + one tanh pass over the packed block, lane-mask select.
        acts = jnp.where(is_g_slot, jnp.tanh(gates), jax.nn.sigmoid(gates))
        i_g = acts[:, 0 * H:1 * H]
        f_g = acts[:, 1 * H:2 * H]
        g_g = acts[:, 2 * H:3 * H]
        o_g = acts[:, 3 * H:4 * H]
        c_new = f_g * c + i_g * g_g                    # f32 state math
        h_new = o_g * jnp.tanh(c_new)
        h_all_sc[pl.ds(row, batch), :] = h_new
        return h_new, c_new

    h0 = jnp.zeros((batch, H), jnp.float32)
    c0 = jnp.zeros((batch, H), jnp.float32)
    # Bounded partial unroll: the chain is serial, so unrolling past a few steps
    # buys no ILP but bloats instruction memory for long sequences.
    lax.fori_loop(0, seq_len, step, (h0, c0), unroll=min(8, seq_len))

    # Phase 3: classifier for ALL timesteps as one batched MXU matmul, written
    # as a single lane-dense (S*B, 256) store.
    out_ref[...] = (jnp.dot(h_all_sc[...].astype(jnp.bfloat16), wc_ref[...],
                            preferred_element_type=jnp.float32)
                    + bc_ref[...])


def pixel_rnn_pallas(x_flat, wih_b, whh_b, bias, wc_b, bc_p, *, seq_len, batch):
    """x_flat: (S*B, H) bf16. Returns (S*B, Cp) f32 logits (lane-padded)."""
    SB, H = x_flat.shape
    G = 4 * H
    Cp = wc_b.shape[-1]

    kernel = functools.partial(_pixel_rnn_kernel,
                               seq_len=seq_len, batch=batch, hid=H)

    # Advisory cost estimate (counts packed work, not padded work).
    flops = 2 * SB * H * G          # input projection
    flops += 2 * SB * H * G         # recurrent projection (S steps of B x H x 4H)
    flops += 2 * SB * H * Cp        # classifier
    transcendentals = SB * (2 * G + H)   # sigmoid+tanh on packed gates + tanh(c)
    bytes_accessed = (2 * (SB * H + 2 * H * G + H * Cp)   # bf16 inputs
                      + 4 * (G + Cp + SB * Cp))           # f32 biases + output

    grid_spec = pltpu.PrefetchScalarGridSpec(
        num_scalar_prefetch=0,
        grid=(1,),
        in_specs=[
            pl.BlockSpec((SB, H), lambda i: (0, 0)),   # x (all timesteps), bf16
            pl.BlockSpec((H, G), lambda i: (0, 0)),    # W_ih^T packed, bf16
            pl.BlockSpec((H, G), lambda i: (0, 0)),    # W_hh^T packed, bf16
            pl.BlockSpec((1, G), lambda i: (0, 0)),    # bias, f32
            pl.BlockSpec((H, Cp), lambda i: (0, 0)),   # W_c^T, bf16
            pl.BlockSpec((1, Cp), lambda i: (0, 0)),   # b_c, f32
        ],
        out_specs=pl.BlockSpec((SB, Cp), lambda i: (0, 0)),
        scratch_shapes=[
            pltpu.VMEM((SB, G), jnp.float32),   # precomputed input gates
            pltpu.VMEM((SB, H), jnp.float32),   # buffered hidden states
        ],
    )

    return pl.pallas_call(
        kernel,
        out_shape=jax.ShapeDtypeStruct((SB, Cp), jnp.float32),
        grid_spec=grid_spec,
        compiler_params=pltpu.CompilerParams(
            dimension_semantics=("arbitrary",),   # sequential recurrence inside
            vmem_limit_bytes=32 * 1024 * 1024,    # explicit; tiny usage here
        ),
        cost_estimate=pl.CostEstimate(
            flops=flops,
            transcendentals=transcendentals,
            bytes_accessed=bytes_accessed,
        ),
    )(x_flat, wih_b, whh_b, bias, wc_b, bc_p)


# ------------------------------ JAX wrapper -------------------------------- #
def pixel_rnn_forward(x_ids, params):
    """x_ids: (B, S) int32 token ids.  Returns (B, S, CORLOR_CNT) f32 logits."""
    B, S = x_ids.shape
    H = params["wih_t"].shape[0]          # 32 -> packed gate block 4H = 128
    C = params["wc_t"].shape[1]
    Cp = _round_up(C, 128)                # 167 -> 256: lane-dense output stores

    # Embedding gather directly in time-major order (S, B, H); bf16 matmul operand.
    emb = jnp.take(params["embed"], x_ids.T, axis=0)
    x_flat = emb.reshape(S * B, H).astype(jnp.bfloat16)

    # Packed-gate layout == PyTorch's native i|f|g|o column order: no gate padding.
    wih_b = params["wih_t"].astype(jnp.bfloat16)          # (H, 4H)
    whh_b = params["whh_t"].astype(jnp.bfloat16)          # (H, 4H)
    bias = params["bias"].astype(jnp.float32)             # (1, 4H)
    wc_b = jnp.pad(params["wc_t"], ((0, 0), (0, Cp - C))).astype(jnp.bfloat16)
    bc_p = jnp.pad(params["bc"], ((0, 0), (0, Cp - C))).astype(jnp.float32)

    out_flat = pixel_rnn_pallas(x_flat, wih_b, whh_b, bias, wc_b, bc_p,
                                seq_len=S, batch=B)
    out_sbc = out_flat.reshape(S, B, Cp)[:, :, :C]
    return jnp.transpose(out_sbc, (1, 0, 2))              # (B, S, C)


# ------------------------ pure-JAX reference (check) ----------------------- #
def pixel_rnn_reference(x_ids, params):
    emb = jnp.take(params["embed"], x_ids, axis=0)         # (B, S, H) f32
    B, S, H = emb.shape

    def step(carry, x_t):
        h, c = carry
        gates = x_t @ params["wih_t"] + h @ params["whh_t"] + params["bias"][0]
        i_g = jax.nn.sigmoid(gates[:, 0 * H:1 * H])
        f_g = jax.nn.sigmoid(gates[:, 1 * H:2 * H])
        g_g = jnp.tanh(gates[:, 2 * H:3 * H])
        o_g = jax.nn.sigmoid(gates[:, 3 * H:4 * H])
        c_new = f_g * c + i_g * g_g
        h_new = o_g * jnp.tanh(c_new)
        logits = h_new @ params["wc_t"] + params["bc"][0]
        return (h_new, c_new), logits

    h0 = jnp.zeros((B, H), jnp.float32)
    c0 = jnp.zeros((B, H), jnp.float32)
    _, outs = lax.scan(step, (h0, c0), jnp.transpose(emb, (1, 0, 2)))
    return jnp.transpose(outs, (1, 0, 2))


# --------------------------------- main ------------------------------------ #
def make_params(key, lstm_hid, out_dim, vocab):
    ks = jax.random.split(key, 7)
    bound = 1.0 / jnp.sqrt(lstm_hid)
    u = lambda k, shape: jax.random.uniform(k, shape, jnp.float32, -bound, bound)
    embed = jax.random.normal(ks[0], (vocab, lstm_hid), jnp.float32)      # nn.Embedding default
    wih_t = u(ks[1], (lstm_hid, 4 * lstm_hid))                            # W_ih^T (i|f|g|o)
    whh_t = u(ks[2], (lstm_hid, 4 * lstm_hid))                            # W_hh^T (i|f|g|o)
    bias = (u(ks[3], (1, 4 * lstm_hid)) + u(ks[4], (1, 4 * lstm_hid)))    # b_ih + b_hh
    wc_t = u(ks[5], (lstm_hid, out_dim))                                  # classifier W^T
    bc = u(ks[6], (1, out_dim))
    return dict(embed=embed, wih_t=wih_t, whh_t=whh_t, bias=bias, wc_t=wc_t, bc=bc)


if __name__ == "__main__":
    B, S, H = 8, 8, 32          # batch, seq len, lstm_hid
    key = jax.random.PRNGKey(0)
    k_param, k_x = jax.random.split(key)

    params = make_params(k_param, H, CORLOR_CNT, CORLOR_CNT)
    x_ids = jax.random.randint(k_x, (B, S), 0, CORLOR_CNT, dtype=jnp.int32)

    out = jax.block_until_ready(pixel_rnn_forward(x_ids, params))
    ref = jax.block_until_ready(pixel_rnn_reference(x_ids, params))

    assert out.shape == (B, S, CORLOR_CNT), out.shape
    # bf16 matmul operands (f32 accumulation) vs f32 reference: loosened tolerance.
    assert jnp.allclose(out, ref, atol=3e-2, rtol=3e-2), "mismatch vs reference"
    print("KERNEL_OK")
</pallas_src>

<mosaic_0001>
module attributes {stable_mosaic.version = 11 : i64} {
  func.func @_pixel_rnn_kernel(%arg0: i32, %arg1: memref<64x32xbf16, #tpu.memory_space<vmem>>, %arg2: memref<32x128xbf16, #tpu.memory_space<vmem>>, %arg3: memref<32x128xbf16, #tpu.memory_space<vmem>>, %arg4: memref<1x128xf32, #tpu.memory_space<vmem>>, %arg5: memref<32x256xbf16, #tpu.memory_space<vmem>>, %arg6: memref<1x256xf32, #tpu.memory_space<vmem>>, %arg7: memref<64x256xf32, #tpu.memory_space<vmem>>, %arg8: memref<64x128xf32, #tpu.memory_space<vmem>>, %arg9: memref<64x32xf32, #tpu.memory_space<vmem>>) attributes {dimension_semantics = [#tpu.dimension_semantics<arbitrary>], iteration_bounds = array<i64: 1>, scalar_prefetch = 0 : i64, scratch_operands = 2 : i64, tpu.core_type = #tpu.core_type<tc>, window_params = [{pipeline_mode = #tpu.pipeline_mode<synchronous>, transform_indices = @transform_0, window_bounds = array<i64: 64, 32>}, {pipeline_mode = #tpu.pipeline_mode<synchronous>, transform_indices = @transform_1, window_bounds = array<i64: 32, 128>}, {pipeline_mode = #tpu.pipeline_mode<synchronous>, transform_indices = @transform_2, window_bounds = array<i64: 32, 128>}, {pipeline_mode = #tpu.pipeline_mode<synchronous>, transform_indices = @transform_3, window_bounds = array<i64: 1, 128>}, {pipeline_mode = #tpu.pipeline_mode<synchronous>, transform_indices = @transform_4, window_bounds = array<i64: 32, 256>}, {pipeline_mode = #tpu.pipeline_mode<synchronous>, transform_indices = @transform_5, window_bounds = array<i64: 1, 256>}, {pipeline_mode = #tpu.pipeline_mode<synchronous>, transform_indices = @transform_6, window_bounds = array<i64: 64, 256>}]} {
    %c0 = arith.constant 0 : index
    %c0_0 = arith.constant 0 : index
    %0 = vector.load %arg1[%c0, %c0_0] : memref<64x32xbf16, #tpu.memory_space<vmem>>, vector<64x32xbf16>
    %c0_1 = arith.constant 0 : index
    %c0_2 = arith.constant 0 : index
    %1 = vector.load %arg2[%c0_1, %c0_2] : memref<32x128xbf16, #tpu.memory_space<vmem>>, vector<32x128xbf16>
    %cst = arith.constant dense<0.000000e+00> : vector<64x128xf32>
    %2 = tpu.matmul %0, %1, %cst {dimension_numbers = #tpu.dot_dimension_numbers<[1], [0], [0], [1], [0, 0, 1, 1], [], []>} : vector<64x32xbf16>, vector<32x128xbf16>, vector<64x128xf32> -> vector<64x128xf32>
    %c0_3 = arith.constant 0 : index
    %c0_4 = arith.constant 0 : index
    %3 = vector.load %arg4[%c0_3, %c0_4] : memref<1x128xf32, #tpu.memory_space<vmem>>, vector<1x128xf32>
    %4 = vector.broadcast %3 : vector<1x128xf32> to vector<64x128xf32>
    %5 = arith.addf %2, %4 : vector<64x128xf32>
    %c0_5 = arith.constant 0 : index
    %c0_6 = arith.constant 0 : index
    %6 = vector.load %arg8[%c0_5, %c0_6] : memref<64x128xf32, #tpu.memory_space<vmem>>, vector<64x128xf32>
    tpu.vector_store %arg8[%c0_5, %c0_6], %5 {strides = array<i32>} : memref<64x128xf32, #tpu.memory_space<vmem>>, vector<64x128xf32>,
    %7 = tpu.iota {dimensions = array<i32: 1>} : vector<8x128xi32>
    %c64_i32 = arith.constant 64 : i32
    %8 = vector.broadcast %c64_i32 : i32 to vector<8x128xi32>
    %9 = arith.cmpi sge, %7, %8 : vector<8x128xi32>
    %c96_i32 = arith.constant 96 : i32
    %10 = vector.broadcast %c96_i32 : i32 to vector<8x128xi32>
    %11 = arith.cmpi slt, %7, %10 : vector<8x128xi32>
    %12 = arith.andi %9, %11 : vector<8x128xi1>
    %cst_7 = arith.constant 0.000000e+00 : f32
    %13 = vector.broadcast %cst_7 : f32 to vector<8x32xf32>
    %cst_8 = arith.constant 0.000000e+00 : f32
    %14 = vector.broadcast %cst_8 : f32 to vector<8x32xf32>
    %c0_i32 = arith.constant 0 : i32
    %c8_i32 = arith.constant 8 : i32
    %15 = arith.muli %c0_i32, %c8_i32 : i32
    %16 = tpu.assume_multiple %15, 8 : i32
    %17 = arith.index_cast %16 : i32 to index
    %c0_9 = arith.constant 0 : index
    %18 = vector.load %arg8[%17, %c0_9] : memref<64x128xf32, #tpu.memory_space<vmem>>, vector<8x128xf32>
    %19 = arith.truncf %13 : vector<8x32xf32> to vector<8x32xbf16>
    %c0_10 = arith.constant 0 : index
    %c0_11 = arith.constant 0 : index
    %20 = vector.load %arg3[%c0_10, %c0_11] : memref<32x128xbf16, #tpu.memory_space<vmem>>, vector<32x128xbf16>
    %cst_12 = arith.constant dense<0.000000e+00> : vector<8x128xf32>
    %21 = tpu.matmul %19, %20, %cst_12 {dimension_numbers = #tpu.dot_dimension_numbers<[1], [0], [0], [1], [0, 0, 1, 1], [], []>} : vector<8x32xbf16>, vector<32x128xbf16>, vector<8x128xf32> -> vector<8x128xf32>
    %22 = arith.addf %18, %21 : vector<8x128xf32>
    %23 = math.tanh %22 : vector<8x128xf32>
    %24 = arith.negf %22 : vector<8x128xf32>
    %25 = math.exp %24 : vector<8x128xf32>
    %cst_13 = arith.constant 1.000000e+00 : f32
    %26 = vector.broadcast %cst_13 : f32 to vector<8x128xf32>
    %27 = arith.addf %26, %25 : vector<8x128xf32>
    %28 = arith.divf %26, %27 : vector<8x128xf32>
    %29 = arith.select %12, %23, %28 : vector<8x128xi1>, vector<8x128xf32>
    %30 = vector.extract_strided_slice %29 {offsets = [0, 0], sizes = [8, 32], strides = [1, 1]} : vector<8x128xf32> to vector<8x32xf32>
    %31 = vector.extract_strided_slice %29 {offsets = [0, 32], sizes = [8, 32], strides = [1, 1]} : vector<8x128xf32> to vector<8x32xf32>
    %32 = vector.extract_strided_slice %29 {offsets = [0, 64], sizes = [8, 32], strides = [1, 1]} : vector<8x128xf32> to vector<8x32xf32>
    %33 = vector.extract_strided_slice %29 {offsets = [0, 96], sizes = [8, 32], strides = [1, 1]} : vector<8x128xf32> to vector<8x32xf32>
    %34 = arith.mulf %31, %14 : vector<8x32xf32>
    %35 = arith.mulf %30, %32 : vector<8x32xf32>
    %36 = arith.addf %34, %35 : vector<8x32xf32>
    %37 = math.tanh %36 : vector<8x32xf32>
    %38 = arith.mulf %33, %37 : vector<8x32xf32>
    %39 = arith.index_cast %16 : i32 to index
    %c0_14 = arith.constant 0 : index
    %40 = vector.load %arg9[%39, %c0_14] : memref<64x32xf32, #tpu.memory_space<vmem>>, vector<8x32xf32>
    tpu.vector_store %arg9[%39, %c0_14], %38 {strides = array<i32>} : memref<64x32xf32, #tpu.memory_space<vmem>>, vector<8x32xf32>,
    %c1_i32 = arith.constant 1 : i32
    %c8_i32_15 = arith.constant 8 : i32
    %41 = arith.muli %c1_i32, %c8_i32_15 : i32
    %42 = tpu.assume_multiple %41, 8 : i32
    %43 = arith.index_cast %42 : i32 to index
    %c0_16 = arith.constant 0 : index
    %44 = vector.load %arg8[%43, %c0_16] : memref<64x128xf32, #tpu.memory_space<vmem>>, vector<8x128xf32>
    %45 = arith.truncf %38 : vector<8x32xf32> to vector<8x32xbf16>
    %c0_17 = arith.constant 0 : index
    %c0_18 = arith.constant 0 : index
    %46 = vector.load %arg3[%c0_17, %c0_18] : memref<32x128xbf16, #tpu.memory_space<vmem>>, vector<32x128xbf16>
    %cst_19 = arith.constant dense<0.000000e+00> : vector<8x128xf32>
    %47 = tpu.matmul %45, %46, %cst_19 {dimension_numbers = #tpu.dot_dimension_numbers<[1], [0], [0], [1], [0, 0, 1, 1], [], []>} : vector<8x32xbf16>, vector<32x128xbf16>, vector<8x128xf32> -> vector<8x128xf32>
    %48 = arith.addf %44, %47 : vector<8x128xf32>
    %49 = math.tanh %48 : vector<8x128xf32>
    %50 = arith.negf %48 : vector<8x128xf32>
    %51 = math.exp %50 : vector<8x128xf32>
    %cst_20 = arith.constant 1.000000e+00 : f32
    %52 = vector.broadcast %cst_20 : f32 to vector<8x128xf32>
    %53 = arith.addf %52, %51 : vector<8x128xf32>
    %54 = arith.divf %52, %53 : vector<8x128xf32>
    %55 = arith.select %12, %49, %54 : vector<8x128xi1>, vector<8x128xf32>
    %56 = vector.extract_strided_slice %55 {offsets = [0, 0], sizes = [8, 32], strides = [1, 1]} : vector<8x128xf32> to vector<8x32xf32>
    %57 = vector.extract_strided_slice %55 {offsets = [0, 32], sizes = [8, 32], strides = [1, 1]} : vector<8x128xf32> to vector<8x32xf32>
    %58 = vector.extract_strided_slice %55 {offsets = [0, 64], sizes = [8, 32], strides = [1, 1]} : vector<8x128xf32> to vector<8x32xf32>
    %59 = vector.extract_strided_slice %55 {offsets = [0, 96], sizes = [8, 32], strides = [1, 1]} : vector<8x128xf32> to vector<8x32xf32>
    %60 = arith.mulf %57, %36 : vector<8x32xf32>
    %61 = arith.mulf %56, %58 : vector<8x32xf32>
    %62 = arith.addf %60, %61 : vector<8x32xf32>
    %63 = math.tanh %62 : vector<8x32xf32>
    %64 = arith.mulf %59, %63 : vector<8x32xf32>
    %65 = arith.index_cast %42 : i32 to index
    %c0_21 = arith.constant 0 : index
    %66 = vector.load %arg9[%65, %c0_21] : memref<64x32xf32, #tpu.memory_space<vmem>>, vector<8x32xf32>
    tpu.vector_store %arg9[%65, %c0_21], %64 {strides = array<i32>} : memref<64x32xf32, #tpu.memory_space<vmem>>, vector<8x32xf32>,
    %c2_i32 = arith.constant 2 : i32
    %c8_i32_22 = arith.constant 8 : i32
    %67 = arith.muli %c2_i32, %c8_i32_22 : i32
    %68 = tpu.assume_multiple %67, 8 : i32
    %69 = arith.index_cast %68 : i32 to index
    %c0_23 = arith.constant 0 : index
    %70 = vector.load %arg8[%69, %c0_23] : memref<64x128xf32, #tpu.memory_space<vmem>>, vector<8x128xf32>
    %71 = arith.truncf %64 : vector<8x32xf32> to vector<8x32xbf16>
    %c0_24 = arith.constant 0 : index
    %c0_25 = arith.constant 0 : index
    %72 = vector.load %arg3[%c0_24, %c0_25] : memref<32x128xbf16, #tpu.memory_space<vmem>>, vector<32x128xbf16>
    %cst_26 = arith.constant dense<0.000000e+00> : vector<8x128xf32>
    %73 = tpu.matmul %71, %72, %cst_26 {dimension_numbers = #tpu.dot_dimension_numbers<[1], [0], [0], [1], [0, 0, 1, 1], [], []>} : vector<8x32xbf16>, vector<32x128xbf16>, vector<8x128xf32> -> vector<8x128xf32>
    %74 = arith.addf %70, %73 : vector<8x128xf32>
    %75 = math.tanh %74 : vector<8x128xf32>
    %76 = arith.negf %74 : vector<8x128xf32>
    %77 = math.exp %76 : vector<8x128xf32>
    %cst_27 = arith.constant 1.000000e+00 : f32
    %78 = vector.broadcast %cst_27 : f32 to vector<8x128xf32>
    %79 = arith.addf %78, %77 : vector<8x128xf32>
    %80 = arith.divf %78, %79 : vector<8x128xf32>
    %81 = arith.select %12, %75, %80 : vector<8x128xi1>, vector<8x128xf32>
    %82 = vector.extract_strided_slice %81 {offsets = [0, 0], sizes = [8, 32], strides = [1, 1]} : vector<8x128xf32> to vector<8x32xf32>
    %83 = vector.extract_strided_slice %81 {offsets = [0, 32], sizes = [8, 32], strides = [1, 1]} : vector<8x128xf32> to vector<8x32xf32>
    %84 = vector.extract_strided_slice %81 {offsets = [0, 64], sizes = [8, 32], strides = [1, 1]} : vector<8x128xf32> to vector<8x32xf32>
    %85 = vector.extract_strided_slice %81 {offsets = [0, 96], sizes = [8, 32], strides = [1, 1]} : vector<8x128xf32> to vector<8x32xf32>
    %86 = arith.mulf %83, %62 : vector<8x32xf32>
    %87 = arith.mulf %82, %84 : vector<8x32xf32>
    %88 = arith.addf %86, %87 : vector<8x32xf32>
    %89 = math.tanh %88 : vector<8x32xf32>
    %90 = arith.mulf %85, %89 : vector<8x32xf32>
    %91 = arith.index_cast %68 : i32 to index
    %c0_28 = arith.constant 0 : index
    %92 = vector.load %arg9[%91, %c0_28] : memref<64x32xf32, #tpu.memory_space<vmem>>, vector<8x32xf32>
    tpu.vector_store %arg9[%91, %c0_28], %90 {strides = array<i32>} : memref<64x32xf32, #tpu.memory_space<vmem>>, vector<8x32xf32>,
    %c3_i32 = arith.constant 3 : i32
    %c8_i32_29 = arith.constant 8 : i32
    %93 = arith.muli %c3_i32, %c8_i32_29 : i32
    %94 = tpu.assume_multiple %93, 8 : i32
    %95 = arith.index_cast %94 : i32 to index
    %c0_30 = arith.constant 0 : index
    %96 = vector.load %arg8[%95, %c0_30] : memref<64x128xf32, #tpu.memory_space<vmem>>, vector<8x128xf32>
    %97 = arith.truncf %90 : vector<8x32xf32> to vector<8x32xbf16>
    %c0_31 = arith.constant 0 : index
    %c0_32 = arith.constant 0 : index
    %98 = vector.load %arg3[%c0_31, %c0_32] : memref<32x128xbf16, #tpu.memory_space<vmem>>, vector<32x128xbf16>
    %cst_33 = arith.constant dense<0.000000e+00> : vector<8x128xf32>
    %99 = tpu.matmul %97, %98, %cst_33 {dimension_numbers = #tpu.dot_dimension_numbers<[1], [0], [0], [1], [0, 0, 1, 1], [], []>} : vector<8x32xbf16>, vector<32x128xbf16>, vector<8x128xf32> -> vector<8x128xf32>
    %100 = arith.addf %96, %99 : vector<8x128xf32>
    %101 = math.tanh %100 : vector<8x128xf32>
    %102 = arith.negf %100 : vector<8x128xf32>
    %103 = math.exp %102 : vector<8x128xf32>
    %cst_34 = arith.constant 1.000000e+00 : f32
    %104 = vector.broadcast %cst_34 : f32 to vector<8x128xf32>
    %105 = arith.addf %104, %103 : vector<8x128xf32>
    %106 = arith.divf %104, %105 : vector<8x128xf32>
    %107 = arith.select %12, %101, %106 : vector<8x128xi1>, vector<8x128xf32>
    %108 = vector.extract_strided_slice %107 {offsets = [0, 0], sizes = [8, 32], strides = [1, 1]} : vector<8x128xf32> to vector<8x32xf32>
    %109 = vector.extract_strided_slice %107 {offsets = [0, 32], sizes = [8, 32], strides = [1, 1]} : vector<8x128xf32> to vector<8x32xf32>
    %110 = vector.extract_strided_slice %107 {offsets = [0, 64], sizes = [8, 32], strides = [1, 1]} : vector<8x128xf32> to vector<8x32xf32>
    %111 = vector.extract_strided_slice %107 {offsets = [0, 96], sizes = [8, 32], strides = [1, 1]} : vector<8x128xf32> to vector<8x32xf32>
    %112 = arith.mulf %109, %88 : vector<8x32xf32>
    %113 = arith.mulf %108, %110 : vector<8x32xf32>
    %114 = arith.addf %112, %113 : vector<8x32xf32>
    %115 = math.tanh %114 : vector<8x32xf32>
    %116 = arith.mulf %111, %115 : vector<8x32xf32>
    %117 = arith.index_cast %94 : i32 to index
    %c0_35 = arith.constant 0 : index
    %118 = vector.load %arg9[%117, %c0_35] : memref<64x32xf32, #tpu.memory_space<vmem>>, vector<8x32xf32>
    tpu.vector_store %arg9[%117, %c0_35], %116 {strides = array<i32>} : memref<64x32xf32, #tpu.memory_space<vmem>>, vector<8x32xf32>,
    %c4_i32 = arith.constant 4 : i32
    %c8_i32_36 = arith.constant 8 : i32
    %119 = arith.muli %c4_i32, %c8_i32_36 : i32
    %120 = tpu.assume_multiple %119, 8 : i32
    %121 = arith.index_cast %120 : i32 to index
    %c0_37 = arith.constant 0 : index
    %122 = vector.load %arg8[%121, %c0_37] : memref<64x128xf32, #tpu.memory_space<vmem>>, vector<8x128xf32>
    %123 = arith.truncf %116 : vector<8x32xf32> to vector<8x32xbf16>
    %c0_38 = arith.constant 0 : index
    %c0_39 = arith.constant 0 : index
    %124 = vector.load %arg3[%c0_38, %c0_39] : memref<32x128xbf16, #tpu.memory_space<vmem>>, vector<32x128xbf16>
    %cst_40 = arith.constant dense<0.000000e+00> : vector<8x128xf32>
    %125 = tpu.matmul %123, %124, %cst_40 {dimension_numbers = #tpu.dot_dimension_numbers<[1], [0], [0], [1], [0, 0, 1, 1], [], []>} : vector<8x32xbf16>, vector<32x128xbf16>, vector<8x128xf32> -> vector<8x128xf32>
    %126 = arith.addf %122, %125 : vector<8x128xf32>
    %127 = math.tanh %126 : vector<8x128xf32>
    %128 = arith.negf %126 : vector<8x128xf32>
    %129 = math.exp %128 : vector<8x128xf32>
    %cst_41 = arith.constant 1.000000e+00 : f32
    %130 = vector.broadcast %cst_41 : f32 to vector<8x128xf32>
    %131 = arith.addf %130, %129 : vector<8x128xf32>
    %132 = arith.divf %130, %131 : vector<8x128xf32>
    %133 = arith.select %12, %127, %132 : vector<8x128xi1>, vector<8x128xf32>
    %134 = vector.extract_strided_slice %133 {offsets = [0, 0], sizes = [8, 32], strides = [1, 1]} : vector<8x128xf32> to vector<8x32xf32>
    %135 = vector.extract_strided_slice %133 {offsets = [0, 32], sizes = [8, 32], strides = [1, 1]} : vector<8x128xf32> to vector<8x32xf32>
    %136 = vector.extract_strided_slice %133 {offsets = [0, 64], sizes = [8, 32], strides = [1, 1]} : vector<8x128xf32> to vector<8x32xf32>
    %137 = vector.extract_strided_slice %133 {offsets = [0, 96], sizes = [8, 32], strides = [1, 1]} : vector<8x128xf32> to vector<8x32xf32>
    %138 = arith.mulf %135, %114 : vector<8x32xf32>
    %139 = arith.mulf %134, %136 : vector<8x32xf32>
    %140 = arith.addf %138, %139 : vector<8x32xf32>
    %141 = math.tanh %140 : vector<8x32xf32>
    %142 = arith.mulf %137, %141 : vector<8x32xf32>
    %143 = arith.index_cast %120 : i32 to index
    %c0_42 = arith.constant 0 : index
    %144 = vector.load %arg9[%143, %c0_42] : memref<64x32xf32, #tpu.memory_space<vmem>>, vector<8x32xf32>
    tpu.vector_store %arg9[%143, %c0_42], %142 {strides = array<i32>} : memref<64x32xf32, #tpu.memory_space<vmem>>, vector<8x32xf32>,
    %c5_i32 = arith.constant 5 : i32
    %c8_i32_43 = arith.constant 8 : i32
    %145 = arith.muli %c5_i32, %c8_i32_43 : i32
    %146 = tpu.assume_multiple %145, 8 : i32
    %147 = arith.index_cast %146 : i32 to index
    %c0_44 = arith.constant 0 : index
    %148 = vector.load %arg8[%147, %c0_44] : memref<64x128xf32, #tpu.memory_space<vmem>>, vector<8x128xf32>
    %149 = arith.truncf %142 : vector<8x32xf32> to vector<8x32xbf16>
    %c0_45 = arith.constant 0 : index
    %c0_46 = arith.constant 0 : index
    %150 = vector.load %arg3[%c0_45, %c0_46] : memref<32x128xbf16, #tpu.memory_space<vmem>>, vector<32x128xbf16>
    %cst_47 = arith.constant dense<0.000000e+00> : vector<8x128xf32>
    %151 = tpu.matmul %149, %150, %cst_47 {dimension_numbers = #tpu.dot_dimension_numbers<[1], [0], [0], [1], [0, 0, 1, 1], [], []>} : vector<8x32xbf16>, vector<32x128xbf16>, vector<8x128xf32> -> vector<8x128xf32>
    %152 = arith.addf %148, %151 : vector<8x128xf32>
    %153 = math.tanh %152 : vector<8x128xf32>
    %154 = arith.negf %152 : vector<8x128xf32>
    %155 = math.exp %154 : vector<8x128xf32>
    %cst_48 = arith.constant 1.000000e+00 : f32
    %156 = vector.broadcast %cst_48 : f32 to vector<8x128xf32>
    %157 = arith.addf %156, %155 : vector<8x128xf32>
    %158 = arith.divf %156, %157 : vector<8x128xf32>
    %159 = arith.select %12, %153, %158 : vector<8x128xi1>, vector<8x128xf32>
    %160 = vector.extract_strided_slice %159 {offsets = [0, 0], sizes = [8, 32], strides = [1, 1]} : vector<8x128xf32> to vector<8x32xf32>
    %161 = vector.extract_strided_slice %159 {offsets = [0, 32], sizes = [8, 32], strides = [1, 1]} : vector<8x128xf32> to vector<8x32xf32>
    %162 = vector.extract_strided_slice %159 {offsets = [0, 64], sizes = [8, 32], strides = [1, 1]} : vector<8x128xf32> to vector<8x32xf32>
    %163 = vector.extract_strided_slice %159 {offsets = [0, 96], sizes = [8, 32], strides = [1, 1]} : vector<8x128xf32> to vector<8x32xf32>
    %164 = arith.mulf %161, %140 : vector<8x32xf32>
    %165 = arith.mulf %160, %162 : vector<8x32xf32>
    %166 = arith.addf %164, %165 : vector<8x32xf32>
    %167 = math.tanh %166 : vector<8x32xf32>
    %168 = arith.mulf %163, %167 : vector<8x32xf32>
    %169 = arith.index_cast %146 : i32 to index
    %c0_49 = arith.constant 0 : index
    %170 = vector.load %arg9[%169, %c0_49] : memref<64x32xf32, #tpu.memory_space<vmem>>, vector<8x32xf32>
    tpu.vector_store %arg9[%169, %c0_49], %168 {strides = array<i32>} : memref<64x32xf32, #tpu.memory_space<vmem>>, vector<8x32xf32>,
    %c6_i32 = arith.constant 6 : i32
    %c8_i32_50 = arith.constant 8 : i32
    %171 = arith.muli %c6_i32, %c8_i32_50 : i32
    %172 = tpu.assume_multiple %171, 8 : i32
    %173 = arith.index_cast %172 : i32 to index
    %c0_51 = arith.constant 0 : index
    %174 = vector.load %arg8[%173, %c0_51] : memref<64x128xf32, #tpu.memory_space<vmem>>, vector<8x128xf32>
    %175 = arith.truncf %168 : vector<8x32xf32> to vector<8x32xbf16>
    %c0_52 = arith.constant 0 : index
    %c0_53 = arith.constant 0 : index
    %176 = vector.load %arg3[%c0_52, %c0_53] : memref<32x128xbf16, #tpu.memory_space<vmem>>, vector<32x128xbf16>
    %cst_54 = arith.constant dense<0.000000e+00> : vector<8x128xf32>
    %177 = tpu.matmul %175, %176, %cst_54 {dimension_numbers = #tpu.dot_dimension_numbers<[1], [0], [0], [1], [0, 0, 1, 1], [], []>} : vector<8x32xbf16>, vector<32x128xbf16>, vector<8x128xf32> -> vector<8x128xf32>
    %178 = arith.addf %174, %177 : vector<8x128xf32>
    %179 = math.tanh %178 : vector<8x128xf32>
    %180 = arith.negf %178 : vector<8x128xf32>
    %181 = math.exp %180 : vector<8x128xf32>
    %cst_55 = arith.constant 1.000000e+00 : f32
    %182 = vector.broadcast %cst_55 : f32 to vector<8x128xf32>
    %183 = arith.addf %182, %181 : vector<8x128xf32>
    %184 = arith.divf %182, %183 : vector<8x128xf32>
    %185 = arith.select %12, %179, %184 : vector<8x128xi1>, vector<8x128xf32>
    %186 = vector.extract_strided_slice %185 {offsets = [0, 0], sizes = [8, 32], strides = [1, 1]} : vector<8x128xf32> to vector<8x32xf32>
    %187 = vector.extract_strided_slice %185 {offsets = [0, 32], sizes = [8, 32], strides = [1, 1]} : vector<8x128xf32> to vector<8x32xf32>
    %188 = vector.extract_strided_slice %185 {offsets = [0, 64], sizes = [8, 32], strides = [1, 1]} : vector<8x128xf32> to vector<8x32xf32>
    %189 = vector.extract_strided_slice %185 {offsets = [0, 96], sizes = [8, 32], strides = [1, 1]} : vector<8x128xf32> to vector<8x32xf32>
    %190 = arith.mulf %187, %166 : vector<8x32xf32>
    %191 = arith.mulf %186, %188 : vector<8x32xf32>
    %192 = arith.addf %190, %191 : vector<8x32xf32>
    %193 = math.tanh %192 : vector<8x32xf32>
    %194 = arith.mulf %189, %193 : vector<8x32xf32>
    %195 = arith.index_cast %172 : i32 to index
    %c0_56 = arith.constant 0 : index
    %196 = vector.load %arg9[%195, %c0_56] : memref<64x32xf32, #tpu.memory_space<vmem>>, vector<8x32xf32>
    tpu.vector_store %arg9[%195, %c0_56], %194 {strides = array<i32>} : memref<64x32xf32, #tpu.memory_space<vmem>>, vector<8x32xf32>,
    %c7_i32 = arith.constant 7 : i32
    %c8_i32_57 = arith.constant 8 : i32
    %197 = arith.muli %c7_i32, %c8_i32_57 : i32
    %198 = tpu.assume_multiple %197, 8 : i32
    %199 = arith.index_cast %198 : i32 to index
    %c0_58 = arith.constant 0 : index
    %200 = vector.load %arg8[%199, %c0_58] : memref<64x128xf32, #tpu.memory_space<vmem>>, vector<8x128xf32>
    %201 = arith.truncf %194 : vector<8x32xf32> to vector<8x32xbf16>
    %c0_59 = arith.constant 0 : index
    %c0_60 = arith.constant 0 : index
    %202 = vector.load %arg3[%c0_59, %c0_60] : memref<32x128xbf16, #tpu.memory_space<vmem>>, vector<32x128xbf16>
    %cst_61 = arith.constant dense<0.000000e+00> : vector<8x128xf32>
    %203 = tpu.matmul %201, %202, %cst_61 {dimension_numbers = #tpu.dot_dimension_numbers<[1], [0], [0], [1], [0, 0, 1, 1], [], []>} : vector<8x32xbf16>, vector<32x128xbf16>, vector<8x128xf32> -> vector<8x128xf32>
    %204 = arith.addf %200, %203 : vector<8x128xf32>
    %205 = math.tanh %204 : vector<8x128xf32>
    %206 = arith.negf %204 : vector<8x128xf32>
    %207 = math.exp %206 : vector<8x128xf32>
    %cst_62 = arith.constant 1.000000e+00 : f32
    %208 = vector.broadcast %cst_62 : f32 to vector<8x128xf32>
    %209 = arith.addf %208, %207 : vector<8x128xf32>
    %210 = arith.divf %208, %209 : vector<8x128xf32>
    %211 = arith.select %12, %205, %210 : vector<8x128xi1>, vector<8x128xf32>
    %212 = vector.extract_strided_slice %211 {offsets = [0, 0], sizes = [8, 32], strides = [1, 1]} : vector<8x128xf32> to vector<8x32xf32>
    %213 = vector.extract_strided_slice %211 {offsets = [0, 32], sizes = [8, 32], strides = [1, 1]} : vector<8x128xf32> to vector<8x32xf32>
    %214 = vector.extract_strided_slice %211 {offsets = [0, 64], sizes = [8, 32], strides = [1, 1]} : vector<8x128xf32> to vector<8x32xf32>
    %215 = vector.extract_strided_slice %211 {offsets = [0, 96], sizes = [8, 32], strides = [1, 1]} : vector<8x128xf32> to vector<8x32xf32>
    %216 = arith.mulf %213, %192 : vector<8x32xf32>
    %217 = arith.mulf %212, %214 : vector<8x32xf32>
    %218 = arith.addf %216, %217 : vector<8x32xf32>
    %219 = math.tanh %218 : vector<8x32xf32>
    %220 = arith.mulf %215, %219 : vector<8x32xf32>
    %221 = arith.index_cast %198 : i32 to index
    %c0_63 = arith.constant 0 : index
    %222 = vector.load %arg9[%221, %c0_63] : memref<64x32xf32, #tpu.memory_space<vmem>>, vector<8x32xf32>
    tpu.vector_store %arg9[%221, %c0_63], %220 {strides = array<i32>} : memref<64x32xf32, #tpu.memory_space<vmem>>, vector<8x32xf32>,
    %c8_i32_64 = arith.constant 8 : i32
    %c0_65 = arith.constant 0 : index
    %c0_66 = arith.constant 0 : index
    %223 = vector.load %arg9[%c0_65, %c0_66] : memref<64x32xf32, #tpu.memory_space<vmem>>, vector<64x32xf32>
    %224 = arith.truncf %223 : vector<64x32xf32> to vector<64x32xbf16>
    %c0_67 = arith.constant 0 : index
    %c0_68 = arith.constant 0 : index
    %225 = vector.load %arg5[%c0_67, %c0_68] : memref<32x256xbf16, #tpu.memory_space<vmem>>, vector<32x256xbf16>
    %cst_69 = arith.constant dense<0.000000e+00> : vector<64x256xf32>
    %226 = tpu.matmul %224, %225, %cst_69 {dimension_numbers = #tpu.dot_dimension_numbers<[1], [0], [0], [1], [0, 0, 1, 1], [], []>} : vector<64x32xbf16>, vector<32x256xbf16>, vector<64x256xf32> -> vector<64x256xf32>
    %c0_70 = arith.constant 0 : index
    %c0_71 = arith.constant 0 : index
    %227 = vector.load %arg6[%c0_70, %c0_71] : memref<1x256xf32, #tpu.memory_space<vmem>>, vector<1x256xf32>
    %228 = vector.broadcast %227 : vector<1x256xf32> to vector<64x256xf32>
    %229 = arith.addf %226, %228 : vector<64x256xf32>
    %c0_72 = arith.constant 0 : index
    %c0_73 = arith.constant 0 : index
    %230 = vector.load %arg7[%c0_72, %c0_73] : memref<64x256xf32, #tpu.memory_space<vmem>>, vector<64x256xf32>
    tpu.vector_store %arg7[%c0_72, %c0_73], %229 {strides = array<i32>} : memref<64x256xf32, #tpu.memory_space<vmem>>, vector<64x256xf32>,
    return
  }
  func.func @transform_0(%arg0: i32) -> (i32, i32) {
    %c0_i32 = arith.constant 0 : i32
    %c0_i32_0 = arith.constant 0 : i32
    %c0_i32_1 = arith.constant 0 : i32
    return %c0_i32, %c0_i32_0 : i32, i32
  }
  func.func @transform_1(%arg0: i32) -> (i32, i32) {
    %c0_i32 = arith.constant 0 : i32
    %c0_i32_0 = arith.constant 0 : i32
    %c0_i32_1 = arith.constant 0 : i32
    return %c0_i32, %c0_i32_0 : i32, i32
  }
  func.func @transform_2(%arg0: i32) -> (i32, i32) {
    %c0_i32 = arith.constant 0 : i32
    %c0_i32_0 = arith.constant 0 : i32
    %c0_i32_1 = arith.constant 0 : i32
    return %c0_i32, %c0_i32_0 : i32, i32
  }
  func.func @transform_3(%arg0: i32) -> (i32, i32) {
    %c0_i32 = arith.constant 0 : i32
    %c0_i32_0 = arith.constant 0 : i32
    %c0_i32_1 = arith.constant 0 : i32
    return %c0_i32, %c0_i32_0 : i32, i32
  }
  func.func @transform_4(%arg0: i32) -> (i32, i32) {
    %c0_i32 = arith.constant 0 : i32
    %c0_i32_0 = arith.constant 0 : i32
    %c0_i32_1 = arith.constant 0 : i32
    return %c0_i32, %c0_i32_0 : i32, i32
  }
  func.func @transform_5(%arg0: i32) -> (i32, i32) {
    %c0_i32 = arith.constant 0 : i32
    %c0_i32_0 = arith.constant 0 : i32
    %c0_i32_1 = arith.constant 0 : i32
    return %c0_i32, %c0_i32_0 : i32, i32
  }
  func.func @transform_6(%arg0: i32) -> (i32, i32) {
    %c0_i32 = arith.constant 0 : i32
    %c0_i32_0 = arith.constant 0 : i32
    %c0_i32_1 = arith.constant 0 : i32
    return %c0_i32, %c0_i32_0 : i32, i32
  }
}

</mosaic_0001>

<bundles_post_ra>
// kernel: tpu_custom_call.1
= control target key start
LH: loop header
LB: loop body
LE: loop exit
PB: predicated region body
PF: predicated region fallthrough
CT: control target
= control target key end

     0   :  { %11 = vsyncpa [#allocation5], 0  ;;  %s1677_s0 = inlined_call_operand.vmem [shape: bf16[64,32], index: 0, kind: input, shape index: {}]   ;;  %s1678_s1 = inlined_call_operand.vmem [shape: bf16[32,128], index: 1, kind: input, shape index: {}]   ;;  %s1679_s2 = inlined_call_operand.hbm [shape: bf16[32,128], index: 2, kind: input, shape index: {}]   ;;  %s1680_s3 = inlined_call_operand.vmem [shape: f32[1,128], index: 3, kind: input, shape index: {}]   ;;  %s1681_s4 = inlined_call_operand.vmem [shape: bf16[32,256], index: 4, kind: input, shape index: {}]   ;;  %s1682_s5 = inlined_call_operand.vmem [shape: f32[1,256], index: 5, kind: input, shape index: {}]   ;;  %s1683_s6 = inlined_call_operand.hbm [shape: f32[64,256], index: 6, kind: output, shape index: {}]  }
   0x1   :  { %12 = vsyncpa [#allocation6], 0  ;;  %s1419_s21 = smov [#allocation4]  }
   0x2   :  { %s22_s22 = sshll.u32 %s1419_s21, 4  ;;  %s23_s22 = int_to_ptr.vmem [resolvable:$true] %s22_s22 }
   0x3   :  { %s1383_s23 = scalar_lea.vmem %s23_s22, 256  ;;  %p1388_p1 = scmp.lt.s32.totalorder %s23_s22, %s23_s22 }
   0x4   :  { %p1384_p0 = scmp.ne.s32.totalorder %s23_s22, %s1383_s23  ;;  %p1389_p2 = scmp.lt.s32.totalorder %s1383_s23, %s1383_s23 }
   0x6   :  { %p1390_p3 = por %p1389_p2, %p1388_p1 }
   0x8   :  { %p1391_p4 = pnand %p1390_p3, %p1384_p0 }
   0xa   :  { %1394 = shalt.err (!%p1391_p4)
}
   0xb   :  { %s1420_s24 = smov 64   ;;  %s1421_s25 = smov 4  }
   0xc   :  { %28 = dma.hbm_to_vmem [thread:$0]  %s1679_s2, 256, %s23_s22, [#allocation5], %s1420_s24, %s1420_s24, %s1421_s25  }
   0xd   :  { %1415 = dma.done.wait [#allocation5], 256  }
   0xe   :  { %1416 = vsyncadd [#allocation5], 4294967040  ;;  %v1422_v0 = vmov 0.0   ;;  %vm1423_vm0 = vmmov 0   ;;  %v1283_v1 = vld [vmem:[%s1678_s1 + $0x8] sm:$0xff]   ;;  %v1284_v2 = vld [vmem:[%s1678_s1] sm:$0xff]   ;;  %v176_v35 = vlaneseq }
   0xf   :  { %1225 = vmatprep.subr.bf16.mxu0 %v1422_v0  ;;  %1229 = vmatprep.mubr.msk.bf16.mxu0 %vm1423_vm0, %v1422_v0  ;;  %vm90_vm1 = vcmask 261120   ;;  %v1285_v3 = vld [vmem:[%s1677_s0] sm:$0xff]   ;;  %v1286_v4 = vld [vmem:[%s1677_s0 + $0x8] sm:$0xff]   ;;  %v1288_v6 = vld [vmem:[%s1677_s0 + $0x10] sm:$0xff]   ;;  %v1424_v9 = vmov 0  }
  0x10   :  { %1197 = vmatprep.subr.bf16.mxu1 %v1283_v1  ;;  %1201 = vmatprep.mubr.msk.bf16.mxu1 %vm90_vm1, %v1285_v3  ;;  %v1287_v5 = vld [vmem:[#allocation4 + $0x8] sm:$0xff]   ;;  %v1290_v7 = vld [vmem:[#allocation4] sm:$0xff]   ;;  %v1289_v8 = vld [vmem:[%s1677_s0 + $0x18] sm:$0xff]   ;;  %v177_v36 = vand.u32 127, %v176_v35  ;;  %s1425_s0 = smov 32  }
  0x11   :  { %1198 = vmatpush3.bf16.msra.mxu1 %v1283_v1  ;;  %v1117_v10 = vld [vmem:[%s1680_s3] ss:$0 sm:$0xff]  ;;  %v1291_v46 = vld [vmem:[#allocation4 + $0x8] sm:$0xff]  }
  0x12   :  { %1199 = vmatprep.subr.bf16.mxu1 %v1284_v2  ;;  %vm178_vm2 = vcmp.ge.s32.totalorder %v177_v36, 64  ;;  %vm179_vm3 = vcmp.lt.s32.totalorder %v177_v36, 96  ;;  %v1292_v47 = vld [vmem:[#allocation4] sm:$0xff]   ;;  %v1295_v36 = vld [vmem:[#allocation4 + $0x8] sm:$0xff]  }
  0x13   :  { %vm1518_vm4 = vmand %vm178_vm2, %vm179_vm3 }
  0x15   :  { %1200 = vmatpush3.bf16.msra.mxu1 %v1284_v2 }
  0x16   :  { %1209 = vmatprep.subr.bf16.mxu1 %v1422_v0 }
  0x18   :  { %1202 = vmatmul.mubr.msk.bf16.vlgmr.msra.gmra.mxu1 %vm90_vm1, %v1286_v4 }
  0x19   :  { %1210 = vmatpush3.bf16.msra.mxu1 %v1287_v5  ;;  %1205 = vmatprep.mubr.msk.bf16.mxu1 %vm90_vm1, %v1288_v6  ;;  %v1293_v6 = vld [vmem:[#allocation4 + $0x8] sm:$0xff]  }
  0x1a   :  { %1211 = vmatprep.subr.bf16.mxu1 %v1422_v0  ;;  %1226 = vmatpush3.bf16.msra.mxu0 %v1293_v6 }
  0x1b   :  { %1227 = vmatprep.subr.bf16.mxu0 %v1422_v0 }
  0x1d   :  { %1212 = vmatpush3.bf16.msra.mxu1 %v1290_v7  ;;  %v1294_v7 = vld [vmem:[#allocation4] sm:$0xff]  }
  0x1e   :  { %1217 = vmatprep.subr.bf16.mxu1 %v1422_v0  ;;  %1228 = vmatpush3.bf16.msra.mxu0 %v1294_v7 }
  0x1f   :  { %1241 = vmatprep.subr.bf16.mxu0 %v1422_v0 }
  0x20   :  { %1206 = vmatmul.mubr.msk.bf16.gmra.mxu1 %vm90_vm1, %v1289_v8 }
  0x21   :  { %1213 = vmatprep.mubr.msk.bf16.mxu1 %vm1423_vm0, %v1422_v0 }
  0x28   :  { %1214 = vmatmul.mubr.bf16.vlgmr.msra.gmra.mxu1 %v1424_v9 }
  0x29   :  { %1221 = vmatprep.mubr.msk.bf16.mxu1 %vm1423_vm0, %v1422_v0  ;;  %1218 = vmatpush3.bf16.msra.mxu1 %v1291_v46 }
  0x2a   :  { %1219 = vmatprep.subr.bf16.mxu1 %v1422_v0 }
  0x2d   :  { %1220 = vmatpush3.bf16.msra.mxu1 %v1292_v47 }
  0x2e   :  { %1233 = vmatprep.subr.bf16.mxu1 %v1422_v0 }
  0xd8   :  { %v1203_v11 = vpop.f32.mrf.mxu1 }
  0xd9   :  { %v1505_v12 = vadd.f32 %v1203_v11, %v1117_v10 }
  0xda   :  { %v137_v13 = vpop.f32.mrf.mxu1 }
  0xdb   :  { %v138_v25 = vadd.f32 %v1117_v10, %v137_v13 }
  0xdc   :  { %v1204_v14 = vpop.f32.mrf.mxu1 }
  0xdd   :  { %v1507_v15 = vadd.f32 %v1204_v14, %v1117_v10 }
  0xde   :  { %v140_v16 = vpop.f32.mrf.mxu1 }
  0xdf   :  { %v141_v17 = vadd.f32 %v1117_v10, %v140_v16 }
  0xe0   :  { %v1207_v18 = vpop.f32.mrf.mxu1 }
  0xe1   :  { %v1509_v19 = vadd.f32 %v1207_v18, %v1117_v10 }
  0xe2   :  { %v153_v20 = vpop.f32.mrf.mxu1 }
  0xe3   :  { %v1511_v21 = vadd.f32 %v1117_v10, %v153_v20 }
  0xe4   :  { %v1208_v22 = vpop.f32.mrf.mxu1 }
  0xe5   :  { %v1513_v23 = vadd.f32 %v1208_v22, %v1117_v10 }
  0xe6   :  { %v156_v24 = vpop.f32.mrf.mxu1 }
  0xe7   :  { %v1515_v26 = vadd.f32 %v1117_v10, %v156_v24 }
  0xe8   :  { %v235_v27 = vpop.f32.mrf.mxu1 }
  0xe9   :  { %v241_v28 = vadd.f32 %v235_v27, %v138_v25 }
  0xea   :  { %v1215_v29 = vpop.f32.mrf.mxu1 }
  0xeb   :  { %v1130_v30 = vmul.f32 -1.442695, %v241_v28 }
  0xec   :  { %v238_v31 = vpop.f32.mrf.mxu1 }
  0xed   :  { %1311 = vpow2.f32 %v1130_v30 }
  0xee   :  { %v1216_v32 = vpop.f32.mrf.mxu1  ;;  %1313 = vtanh.f32 %v241_v28 }
  0xfa   :  { %v1312_v33 = vpop.eup %1311 }
  0xfb   :  { %v246_v34 = vadd.f32 1.0, %v1312_v33  ;;  %v1314_v38 = vpop.eup %1313 }
  0xfd   :  { %1315 = vrcp.f32 %v246_v34 }
 0x10a   :  { %v1316_v39 = vpop.eup %1315 }
 0x10b   :  { %v249_v40 = vsel %vm1518_vm4, %v1314_v38, %v1316_v39  ;;  %v1296_v38 = vld [vmem:[#allocation4] sm:$0xff]  }
 0x10c   :  { %252 = vrot.lane.b32.xlu0 %v249_v40, %s1420_s24  ;;  %v250_v43 = vmul.f32 0.0, %v249_v40 }
 0x17e   :  { %v253_v41 = vpop.permute.xlu0 %252 }
 0x17f   :  { %v255_v42 = vmul.f32 %v253_v41, %v249_v40 }
 0x181   :  { %257 = vrot.lane.b32.xlu0 %v255_v42, %s1425_s0 }
 0x1f3   :  { %v258_v44 = vpop.permute.xlu0 %257 }
 0x1f4   :  { %v260_v45 = vadd.f32 %v258_v44, %v250_v43 }
 0x1f6   :  { %1317 = vtanh.f32 %v260_v45 }
 0x203   :  { %v1318_v48 = vpop.eup %1317 }
 0x204   :  { %263 = vrot.lane.b32.xlu1 %v1318_v48, %s1420_s24 }
 0x276   :  { %v264_v49 = vpop.permute.xlu1 %263 }
 0x277   :  { %v1529_v50 = vmul.f32 %v264_v49, %v249_v40 }
 0x279   :  { %v274_v51 = vpack.c.bf16 %v1529_v50, %v1529_v50 }
 0x27b   :  { %280 = vrot.lane.b32.xlu1 %v274_v51, %s1425_s0 }
 0x2ed   :  { %v281_v52 = vpop.permute.xlu1 %280 }
 0x2ee   :  { %1222 = vmatmul.mubr.msk.bf16.vlgmr.msra.gmra.mxu1 %vm90_vm1, %v281_v52 }
 0x2ef   :  { %1237 = vmatprep.mubr.msk.bf16.mxu1 %vm1423_vm0, %v1422_v0  ;;  %1234 = vmatpush3.bf16.msra.mxu1 %v1295_v36 }
 0x2f0   :  { %1235 = vmatprep.subr.bf16.mxu1 %v1422_v0 }
 0x2f3   :  { %1236 = vmatpush3.bf16.msra.mxu1 %v1296_v38 }
 0x2f4   :  { %1249 = vmatprep.subr.bf16.mxu1 %v1422_v0 }
 0x3ae   :  { %v331_v53 = vpop.f32.mrf.mxu1 }
 0x3af   :  { %v337_v54 = vadd.f32 %v331_v53, %v141_v17 }
 0x3b0   :  { %v1223_v55 = vpop.f32.mrf.mxu1 }
 0x3b1   :  { %v1134_v56 = vmul.f32 -1.442695, %v337_v54 }
 0x3b2   :  { %v334_v57 = vpop.f32.mrf.mxu1 }
 0x3b3   :  { %1319 = vpow2.f32 %v1134_v56 }
 0x3b4   :  { %v1224_v58 = vpop.f32.mrf.mxu1  ;;  %1321 = vtanh.f32 %v337_v54 }
 0x3c0   :  { %v1320_v59 = vpop.eup %1319 }
 0x3c1   :  { %v342_v60 = vadd.f32 1.0, %v1320_v59  ;;  %v1322_v61 = vpop.eup %1321 }
 0x3c3   :  { %1323 = vrcp.f32 %v342_v60  ;;  %v1297_v60 = vld [vmem:[#allocation4 + $0x8] sm:$0xff]  }
 0x3d0   :  { %v1324_v62 = vpop.eup %1323 }
 0x3d1   :  { %v345_v63 = vsel %vm1518_vm4, %v1322_v61, %v1324_v62  ;;  %v1298_v61 = vld [vmem:[#allocation4] sm:$0xff]  }
 0x3d2   :  { %348 = vrot.lane.b32.xlu0 %v345_v63, %s1420_s24  ;;  %v346_v3 = vmul.f32 %v345_v63, %v260_v45 }
 0x444   :  { %v349_v1 = vpop.permute.xlu0 %348 }
 0x445   :  { %v351_v2 = vmul.f32 %v349_v1, %v345_v63 }
 0x447   :  { %353 = vrot.lane.b32.xlu1 %v351_v2, %s1425_s0 }
 0x4b9   :  { %v354_v4 = vpop.permute.xlu1 %353 }
 0x4ba   :  { %v356_v5 = vadd.f32 %v354_v4, %v346_v3 }
 0x4bc   :  { %1325 = vtanh.f32 %v356_v5 }
 0x4c9   :  { %v1326_v8 = vpop.eup %1325 }
 0x4ca   :  { %359 = vrot.lane.b32.xlu0 %v1326_v8, %s1420_s24 }
 0x53c   :  { %v360_v10 = vpop.permute.xlu0 %359 }
 0x53d   :  { %v1544_v11 = vmul.f32 %v360_v10, %v345_v63 }
 0x53f   :  { %v371_v13 = vpack.c.bf16 %v1544_v11, %v1544_v11 }
 0x541   :  { %377 = vrot.lane.b32.xlu1 %v371_v13, %s1425_s0 }
 0x5b3   :  { %v378_v14 = vpop.permute.xlu1 %377 }
 0x5b4   :  { %1230 = vmatmul.mubr.msk.bf16.vlgmr.msra.gmra.mxu0 %vm90_vm1, %v378_v14 }
 0x5b5   :  { %1245 = vmatprep.mubr.msk.bf16.mxu0 %vm1423_vm0, %v1422_v0  ;;  %1242 = vmatpush3.bf16.msra.mxu0 %v1297_v60 }
 0x5b6   :  { %1243 = vmatprep.subr.bf16.mxu0 %v1422_v0 }
 0x5b9   :  { %1244 = vmatpush3.bf16.msra.mxu0 %v1298_v61 }
 0x5ba   :  { %1257 = vmatprep.subr.bf16.mxu0 %v1422_v0 }
 0x674   :  { %v428_v16 = vpop.f32.mrf.mxu0 }
 0x675   :  { %v434_v17 = vadd.f32 %v428_v16, %v1505_v12 }
 0x676   :  { %v1231_v18 = vpop.f32.mrf.mxu0 }
 0x677   :  { %v1138_v20 = vmul.f32 -1.442695, %v434_v17 }
 0x678   :  { %v431_v22 = vpop.f32.mrf.mxu0 }
 0x679   :  { %1327 = vpow2.f32 %v1138_v20 }
 0x67a   :  { %v1232_v24 = vpop.f32.mrf.mxu0  ;;  %1329 = vtanh.f32 %v434_v17 }
 0x686   :  { %v1328_v25 = vpop.eup %1327 }
 0x687   :  { %v439_v27 = vadd.f32 1.0, %v1328_v25  ;;  %v1330_v28 = vpop.eup %1329 }
 0x689   :  { %1331 = vrcp.f32 %v439_v27  ;;  %v1299_v27 = vld [vmem:[#allocation4 + $0x8] sm:$0xff]  }
 0x696   :  { %v1332_v29 = vpop.eup %1331 }
 0x697   :  { %v442_v30 = vsel %vm1518_vm4, %v1330_v28, %v1332_v29  ;;  %v1300_v28 = vld [vmem:[#allocation4] sm:$0xff]  }
 0x698   :  { %445 = vrot.lane.b32.xlu0 %v442_v30, %s1420_s24  ;;  %v443_v12 = vmul.f32 %v442_v30, %v356_v5 }
 0x70a   :  { %v446_v31 = vpop.permute.xlu0 %445 }
 0x70b   :  { %v448_v32 = vmul.f32 %v446_v31, %v442_v30 }
 0x70d   :  { %450 = vrot.lane.b32.xlu1 %v448_v32, %s1425_s0 }
 0x77f   :  { %v451_v33 = vpop.permute.xlu1 %450 }
 0x780   :  { %v453_v34 = vadd.f32 %v451_v33, %v443_v12 }
 0x782   :  { %1333 = vtanh.f32 %v453_v34 }
 0x78f   :  { %v1334_v39 = vpop.eup %1333 }
 0x790   :  { %456 = vrot.lane.b32.xlu0 %v1334_v39, %s1420_s24 }
 0x802   :  { %v457_v40 = vpop.permute.xlu0 %456 }
 0x803   :  { %v1560_v41 = vmul.f32 %v457_v40, %v442_v30 }
 0x805   :  { %v468_v42 = vpack.c.bf16 %v1560_v41, %v1560_v41 }
 0x807   :  { %474 = vrot.lane.b32.xlu1 %v468_v42, %s1425_s0 }
 0x879   :  { %v475_v43 = vpop.permute.xlu1 %474 }
 0x87a   :  { %1238 = vmatmul.mubr.msk.bf16.vlgmr.msra.gmra.mxu1 %vm90_vm1, %v475_v43 }
 0x87b   :  { %1253 = vmatprep.mubr.msk.bf16.mxu1 %vm1423_vm0, %v1422_v0  ;;  %1250 = vmatpush3.bf16.msra.mxu1 %v1299_v27 }
 0x87c   :  { %1251 = vmatprep.subr.bf16.mxu1 %v1422_v0 }
 0x87f   :  { %1252 = vmatpush3.bf16.msra.mxu1 %v1300_v28 }
 0x880   :  { %1265 = vmatprep.subr.bf16.mxu1 %v1422_v0 }
 0x93a   :  { %v525_v44 = vpop.f32.mrf.mxu1 }
 0x93b   :  { %v531_v45 = vadd.f32 %v525_v44, %v1507_v15 }
 0x93c   :  { %v1239_v46 = vpop.f32.mrf.mxu1 }
 0x93d   :  { %v1142_v47 = vmul.f32 -1.442695, %v531_v45 }
 0x93e   :  { %v528_v48 = vpop.f32.mrf.mxu1 }
 0x93f   :  { %1335 = vpow2.f32 %v1142_v47 }
 0x940   :  { %v1240_v49 = vpop.f32.mrf.mxu1  ;;  %1337 = vtanh.f32 %v531_v45 }
 0x94c   :  { %v1336_v51 = vpop.eup %1335 }
 0x94d   :  { %v536_v52 = vadd.f32 1.0, %v1336_v51  ;;  %v1338_v53 = vpop.eup %1337 }
 0x94f   :  { %1339 = vrcp.f32 %v536_v52  ;;  %v1301_v52 = vld [vmem:[#allocation4 + $0x8] sm:$0xff]  }
 0x95c   :  { %v1340_v54 = vpop.eup %1339 }
 0x95d   :  { %v539_v55 = vsel %vm1518_vm4, %v1338_v53, %v1340_v54  ;;  %v1302_v53 = vld [vmem:[#allocation4] sm:$0xff]  }
 0x95e   :  { %542 = vrot.lane.b32.xlu0 %v539_v55, %s1420_s24  ;;  %v540_v15 = vmul.f32 %v539_v55, %v453_v34 }
 0x9d0   :  { %v543_v56 = vpop.permute.xlu0 %542 }
 0x9d1   :  { %v545_v57 = vmul.f32 %v543_v56, %v539_v55 }
 0x9d3   :  { %547 = vrot.lane.b32.xlu1 %v545_v57, %s1425_s0 }
 0xa45   :  { %v548_v58 = vpop.permute.xlu1 %547 }
 0xa46   :  { %v550_v59 = vadd.f32 %v548_v58, %v540_v15 }
 0xa48   :  { %1341 = vtanh.f32 %v550_v59 }
 0xa55   :  { %v1342_v62 = vpop.eup %1341 }
 0xa56   :  { %553 = vrot.lane.b32.xlu0 %v1342_v62, %s1420_s24 }
 0xac8   :  { %v554_v63 = vpop.permute.xlu0 %553 }
 0xac9   :  { %v1576_v1 = vmul.f32 %v554_v63, %v539_v55 }
 0xacb   :  { %v565_v2 = vpack.c.bf16 %v1576_v1, %v1576_v1 }
 0xacd   :  { %571 = vrot.lane.b32.xlu1 %v565_v2, %s1425_s0 }
 0xb3f   :  { %v572_v3 = vpop.permute.xlu1 %571 }
 0xb40   :  { %1246 = vmatmul.mubr.msk.bf16.vlgmr.msra.gmra.mxu0 %vm90_vm1, %v572_v3 }
 0xb41   :  { %1261 = vmatprep.mubr.msk.bf16.mxu0 %vm1423_vm0, %v1422_v0  ;;  %1258 = vmatpush3.bf16.msra.mxu0 %v1301_v52 }
 0xb42   :  { %1259 = vmatprep.subr.bf16.mxu0 %v1422_v0 }
 0xb45   :  { %1260 = vmatpush3.bf16.msra.mxu0 %v1302_v53 }
 0xc00   :  { %v622_v4 = vpop.f32.mrf.mxu0 }
 0xc01   :  { %v628_v5 = vadd.f32 %v622_v4, %v1511_v21 }
 0xc02   :  { %v1247_v6 = vpop.f32.mrf.mxu0 }
 0xc03   :  { %v1146_v7 = vmul.f32 -1.442695, %v628_v5 }
 0xc04   :  { %v625_v8 = vpop.f32.mrf.mxu0 }
 0xc05   :  { %1343 = vpow2.f32 %v1146_v7 }
 0xc06   :  { %v1248_v10 = vpop.f32.mrf.mxu0  ;;  %1345 = vtanh.f32 %v628_v5 }
 0xc12   :  { %v1344_v13 = vpop.eup %1343 }
 0xc13   :  { %v633_v14 = vadd.f32 1.0, %v1344_v13  ;;  %v1346_v16 = vpop.eup %1345 }
 0xc15   :  { %1347 = vrcp.f32 %v633_v14  ;;  %v1303_v14 = vld [vmem:[#allocation4 + $0x8] sm:$0xff]  }
 0xc22   :  { %v1348_v17 = vpop.eup %1347 }
 0xc23   :  { %v636_v18 = vsel %vm1518_vm4, %v1346_v16, %v1348_v17  ;;  %v1304_v16 = vld [vmem:[#allocation4] sm:$0xff]  }
 0xc24   :  { %639 = vrot.lane.b32.xlu0 %v636_v18, %s1420_s24  ;;  %v637_v21 = vmul.f32 %v636_v18, %v550_v59 }
 0xc96   :  { %v640_v20 = vpop.permute.xlu0 %639 }
 0xc97   :  { %v642_v22 = vmul.f32 %v640_v20, %v636_v18 }
 0xc99   :  { %644 = vrot.lane.b32.xlu1 %v642_v22, %s1425_s0 }
 0xd0b   :  { %v645_v24 = vpop.permute.xlu1 %644 }
 0xd0c   :  { %v647_v25 = vadd.f32 %v645_v24, %v637_v21 }
 0xd0e   :  { %1349 = vtanh.f32 %v647_v25 }
 0xd1b   :  { %v1350_v29 = vpop.eup %1349 }
 0xd1c   :  { %650 = vrot.lane.b32.xlu0 %v1350_v29, %s1420_s24 }
 0xd8e   :  { %v651_v30 = vpop.permute.xlu0 %650 }
 0xd8f   :  { %v1592_v31 = vmul.f32 %v651_v30, %v636_v18 }
 0xd91   :  { %v662_v32 = vpack.c.bf16 %v1592_v31, %v1592_v31 }
 0xd93   :  { %668 = vrot.lane.b32.xlu1 %v662_v32, %s1425_s0 }
 0xe05   :  { %v669_v12 = vpop.permute.xlu1 %668 }
 0xe06   :  { %1254 = vmatmul.mubr.msk.bf16.vlgmr.msra.gmra.mxu1 %vm90_vm1, %v669_v12 }
 0xe07   :  { %1269 = vmatprep.mubr.msk.bf16.mxu1 %vm1423_vm0, %v1422_v0  ;;  %1266 = vmatpush3.bf16.msra.mxu1 %v1303_v14 }
 0xe08   :  { %1267 = vmatprep.subr.bf16.mxu1 %v1422_v0 }
 0xe0b   :  { %1268 = vmatpush3.bf16.msra.mxu1 %v1304_v16 }
 0xec6   :  { %v719_v33 = vpop.f32.mrf.mxu1 }
 0xec7   :  { %v725_v34 = vadd.f32 %v719_v33, %v1515_v26 }
 0xec8   :  { %v1255_v36 = vpop.f32.mrf.mxu1 }
 0xec9   :  { %v1150_v38 = vmul.f32 -1.442695, %v725_v34 }
 0xeca   :  { %v722_v39 = vpop.f32.mrf.mxu1 }
 0xecb   :  { %1351 = vpow2.f32 %v1150_v38 }
 0xecc   :  { %v1256_v40 = vpop.f32.mrf.mxu1  ;;  %1353 = vtanh.f32 %v725_v34 }
 0xed8   :  { %v1352_v42 = vpop.eup %1351 }
 0xed9   :  { %v730_v43 = vadd.f32 1.0, %v1352_v42  ;;  %v1354_v44 = vpop.eup %1353 }
 0xedb   :  { %1355 = vrcp.f32 %v730_v43  ;;  %v1308_v43 = vld [vmem:[%s1681_s4] ss:$8 sps:$4 sm:$0xff]  }
 0xee8   :  { %v1356_v45 = vpop.eup %1355 }
 0xee9   :  { %v733_v46 = vsel %vm1518_vm4, %v1354_v44, %v1356_v45  ;;  %v1310_v44 = vld [vmem:[%s1681_s4 + $0x4] ss:$8 sps:$4 sm:$0xff]  }
 0xeea   :  { %736 = vrot.lane.b32.xlu0 %v733_v46, %s1420_s24  ;;  %v734_v26 = vmul.f32 %v733_v46, %v647_v25 }
 0xf5c   :  { %v737_v47 = vpop.permute.xlu0 %736 }
 0xf5d   :  { %v739_v48 = vmul.f32 %v737_v47, %v733_v46 }
 0xf5f   :  { %741 = vrot.lane.b32.xlu1 %v739_v48, %s1425_s0 }
 0xfd1   :  { %v742_v49 = vpop.permute.xlu1 %741 }
 0xfd2   :  { %v744_v51 = vadd.f32 %v742_v49, %v734_v26 }
 0xfd4   :  { %1357 = vtanh.f32 %v744_v51 }
 0xfe1   :  { %v1358_v54 = vpop.eup %1357 }
 0xfe2   :  { %747 = vrot.lane.b32.xlu0 %v1358_v54, %s1420_s24 }
0x1054   :  { %v748_v55 = vpop.permute.xlu0 %747 }
0x1055   :  { %v1607_v56 = vmul.f32 %v748_v55, %v733_v46 }
0x1057   :  { %v759_v57 = vpack.c.bf16 %v1607_v56, %v1607_v56 }
0x1059   :  { %765 = vrot.lane.b32.xlu1 %v759_v57, %s1425_s0 }
0x10cb   :  { %v766_v15 = vpop.permute.xlu1 %765 }
0x10cc   :  { %1262 = vmatmul.mubr.msk.bf16.vlgmr.msra.gmra.mxu0 %vm90_vm1, %v766_v15 }
0x10cd   :  { %1043 = vmatprep.mubr.bf16.mxu0 %v1424_v9 }
0x118c   :  { %v816_v58 = vpop.f32.mrf.mxu0 }
0x118d   :  { %v822_v59 = vadd.f32 %v816_v58, %v1509_v19 }
0x118e   :  { %v1263_v60 = vpop.f32.mrf.mxu0 }
0x118f   :  { %v1154_v61 = vmul.f32 -1.442695, %v822_v59 }
0x1190   :  { %v819_v62 = vpop.f32.mrf.mxu0 }
0x1191   :  { %1359 = vpow2.f32 %v1154_v61  ;;  %v970_v62 = vshrl.u32 %v176_v35, 7 }
0x1192   :  { %v1264_v63 = vpop.f32.mrf.mxu0  ;;  %1361 = vtanh.f32 %v822_v59 }
0x1193   :  { %v971_v63 = vsub.s32 0, %v970_v62 }
0x119e   :  { %v1360_v2 = vpop.eup %1359 }
0x119f   :  { %v827_v3 = vadd.f32 1.0, %v1360_v2  ;;  %v1362_v4 = vpop.eup %1361  ;;  %v967_v2 = vld [vmem:[%s1682_s5] sm:$0x3]  ;;  %s1426_s5 = smov [#allocation7]  }
0x11a1   :  { %1363 = vrcp.f32 %v827_v3  ;;  %v975_v3 = vsub.s32 1, %v970_v62 }
0x11ae   :  { %v1364_v5 = vpop.eup %1363 }
0x11af   :  { %v830_v6 = vsel %vm1518_vm4, %v1362_v4, %v1364_v5  ;;  %v972_v4 = vrot.slane %v967_v2, %v971_v63  ;;  %v976_v5 = vrot.slane %v967_v2, %v975_v3 }
0x11b0   :  { %833 = vrot.lane.b32.xlu0 %v830_v6, %s1420_s24  ;;  %v831_v19 = vmul.f32 %v830_v6, %v744_v51 }
0x1222   :  { %v834_v7 = vpop.permute.xlu0 %833 }
0x1223   :  { %v836_v8 = vmul.f32 %v834_v7, %v830_v6 }
0x1225   :  { %838 = vrot.lane.b32.xlu1 %v836_v8, %s1425_s0 }
0x1297   :  { %v839_v10 = vpop.permute.xlu1 %838 }
0x1298   :  { %v841_v13 = vadd.f32 %v839_v10, %v831_v19 }
0x129a   :  { %1365 = vtanh.f32 %v841_v13 }
0x12a7   :  { %v1366_v17 = vpop.eup %1365 }
0x12a8   :  { %844 = vrot.lane.b32.xlu0 %v1366_v17, %s1420_s24 }
0x131a   :  { %v845_v18 = vpop.permute.xlu0 %844 }
0x131b   :  { %v847_v20 = vmul.f32 %v845_v18, %v830_v6 }
0x131d   :  { %v856_v22 = vpack.c.bf16 %v847_v20, %v847_v20 }
0x131f   :  { %862 = vrot.lane.b32.xlu1 %v856_v22, %s1425_s0 }
0x1391   :  { %v863_v21 = vpop.permute.xlu1 %862 }
0x1392   :  { %1270 = vmatmul.mubr.msk.bf16.vlgmr.msra.gmra.mxu1 %vm90_vm1, %v863_v21 }
0x1452   :  { %v913_v24 = vpop.f32.mrf.mxu1 }
0x1453   :  { %v919_v25 = vadd.f32 %v913_v24, %v1513_v23 }
0x1454   :  { %v1271_v27 = vpop.f32.mrf.mxu1 }
0x1455   :  { %v1158_v28 = vmul.f32 -1.442695, %v919_v25 }
0x1456   :  { %v916_v29 = vpop.f32.mrf.mxu1 }
0x1457   :  { %1367 = vpow2.f32 %v1158_v28 }
0x1458   :  { %v1272_v0 = vpop.f32.mrf.mxu1  ;;  %1369 = vtanh.f32 %v919_v25 }
0x1464   :  { %v1368_v30 = vpop.eup %1367 }
0x1465   :  { %v924_v32 = vadd.f32 1.0, %v1368_v30  ;;  %v1370_v12 = vpop.eup %1369 }
0x1467   :  { %1371 = vrcp.f32 %v924_v32 }
0x1474   :  { %v1372_v33 = vpop.eup %1371 }
0x1475   :  { %v927_v34 = vsel %vm1518_vm4, %v1370_v12, %v1372_v33 }
0x1476   :  { %930 = vrot.lane.b32.xlu0 %v927_v34, %s1420_s24  ;;  %v928_v23 = vmul.f32 %v927_v34, %v841_v13 }
0x14e8   :  { %v931_v36 = vpop.permute.xlu0 %930 }
0x14e9   :  { %v933_v38 = vmul.f32 %v931_v36, %v927_v34 }
0x14eb   :  { %935 = vrot.lane.b32.xlu1 %v933_v38, %s1425_s0 }
0x14ef   :  { %268 = vrot.lane.b32.xlu1 %v1529_v50, %s1425_s0  ;;  %v1305_v50 = vld [vmem:[%s1681_s4 + $0x10] ss:$8 sps:$4 sm:$0xff]  }
0x14f3   :  { %461 = vrot.lane.b32.xlu1 %v1560_v41, %s1425_s0  ;;  %v1307_v41 = vld [vmem:[%s1681_s4 + $0x14] ss:$8 sps:$4 sm:$0xff]  }
0x14f4   :  { %1023 = vmatprep.subr.bf16.mxu0 %v1307_v41 }
0x14f5   :  { %1024 = vmatpush1.bf16.msra.mxu0 %v1305_v50 }
0x14f6   :  { %1025 = vmatprep.subr.bf16.mxu0 %v1310_v44 }
0x14f7   :  { %655 = vrot.lane.b32.xlu1 %v1592_v31, %s1425_s0 }
0x14f9   :  { %1026 = vmatpush1.bf16.msra.mxu0 %v1308_v43 }
0x14fb   :  { %849 = vrot.lane.b32.xlu1 %v847_v20, %s1425_s0 }
0x155d   :  { %v936_v37 = vpop.permute.xlu1 %935 }
0x155e   :  { %v938_v39 = vadd.f32 %v936_v37, %v928_v23 }
0x1560   :  { %1373 = vtanh.f32 %v938_v39 }
0x1561   :  { %v269_v40 = vpop.permute.xlu1 %268 }
0x1562   :  { %271 = vst.msk [vmem:[#allocation3] sm:$0xff] %vm90_vm1, %v269_v40 }
0x1565   :  { %v462_v42 = vpop.permute.xlu1 %461 }
0x1566   :  { %465 = vst.msk [vmem:[#allocation3 + $0x10] sm:$0xff] %vm90_vm1, %v462_v42 }
0x1569   :  { %v656_v31 = vpop.permute.xlu1 %655  ;;  %v951_v52 = vld [vmem:[#allocation3] sm:$0xff] }
0x156a   :  { %659 = vst.msk [vmem:[#allocation3 + $0x20] sm:$0xff] %vm90_vm1, %v656_v31 }
0x156d   :  { %v1374_v45 = vpop.eup %1373  ;;  %v850_v46 = vpop.permute.xlu1 %849  ;;  %v953_v54 = vld [vmem:[#allocation3 + $0x10] sm:$0xff] }
0x156e   :  { %853 = vst.msk [vmem:[#allocation3 + $0x30] sm:$0xff] %vm90_vm1, %v850_v46  ;;  %941 = vrot.lane.b32.xlu0 %v1374_v45, %s1420_s24  ;;  %s1105_s24 = sshll.u32 %s1426_s5, 4  ;;  %s1106_s24 = int_to_ptr.vmem [resolvable:$true] %s1105_s24 }
0x156f   :  { %s1395_s25 = scalar_lea.vmem %s1106_s24, 2048  ;;  %p1400_p6 = scmp.lt.s32.totalorder %s1106_s24, %s1106_s24 }
0x1570   :  { %p1396_p5 = scmp.ne.s32.totalorder %s1106_s24, %s1395_s25  ;;  %p1401_p7 = scmp.lt.s32.totalorder %s1395_s25, %s1395_s25 }
0x1571   :  { %v955_v57 = vld [vmem:[#allocation3 + $0x20] sm:$0xff] }
0x1572   :  { %364 = vrot.lane.b32.xlu0 %v1544_v11, %s1425_s0  ;;  %p1402_p8 = por %p1401_p7, %p1400_p6 }
0x1574   :  { %p1403_p9 = pnand %p1402_p8, %p1396_p5 }
0x1575   :  { %v957_v59 = vld [vmem:[#allocation3 + $0x30] sm:$0xff] }
0x1576   :  { %558 = vrot.lane.b32.xlu0 %v1576_v1, %s1425_s0 }
0x157a   :  { %752 = vrot.lane.b32.xlu0 %v1607_v56, %s1425_s0 }
0x15e0   :  { %v942_v47 = vpop.permute.xlu0 %941 }
0x15e1   :  { %v944_v48 = vmul.f32 %v942_v47, %v927_v34 }
0x15e3   :  { %946 = vrot.lane.b32.xlu0 %v944_v48, %s1425_s0 }
0x15e4   :  { %v365_v26 = vpop.permute.xlu0 %364 }
0x15e5   :  { %368 = vst.msk [vmem:[#allocation3 + $0x8] sm:$0xff] %vm90_vm1, %v365_v26 }
0x15e8   :  { %v559_v49 = vpop.permute.xlu0 %558 }
0x15e9   :  { %562 = vst.msk [vmem:[#allocation3 + $0x18] sm:$0xff] %vm90_vm1, %v559_v49 }
0x15ec   :  { %v753_v51 = vpop.permute.xlu0 %752  ;;  %v952_v53 = vld [vmem:[#allocation3 + $0x8] sm:$0xff] }
0x15ed   :  { %756 = vst.msk [vmem:[#allocation3 + $0x28] sm:$0xff] %vm90_vm1, %v753_v51  ;;  %v959_v11 = vpack.c.bf16 %v952_v53, %v951_v52 }
0x15ef   :  { %1163 = vmatmul.mubr.msk.bf16.vlgmr.msra.gmra.mxu0 %vm90_vm1, %v959_v11 }
0x15f0   :  { %1053 = vmatprep.mubr.bf16.mxu0 %v1424_v9  ;;  %v954_v1 = vld [vmem:[#allocation3 + $0x18] sm:$0xff] }
0x15f1   :  { %v960_v55 = vpack.c.bf16 %v954_v1, %v953_v54 }
0x15f4   :  { %v956_v56 = vld [vmem:[#allocation3 + $0x28] sm:$0xff] }
0x15f5   :  { %v961_v15 = vpack.c.bf16 %v956_v56, %v955_v57 }
0x15f7   :  { %1164 = vmatmul.mubr.msk.bf16.gmra.mxu0 %vm90_vm1, %v960_v55 }
0x15f8   :  { %1063 = vmatprep.mubr.bf16.mxu0 %v1424_v9 }
0x15ff   :  { %1165 = vmatmul.mubr.msk.bf16.gmra.mxu0 %vm90_vm1, %v961_v15 }
0x1600   :  { %1073 = vmatprep.mubr.bf16.mxu0 %v1424_v9 }
0x1655   :  { %v947_v58 = vpop.permute.xlu0 %946 }
0x1656   :  { %950 = vst.msk [vmem:[#allocation3 + $0x38] sm:$0xff] %vm90_vm1, %v947_v58 }
0x165d   :  { %v958_v60 = vld [vmem:[#allocation3 + $0x38] sm:$0xff] }
0x165e   :  { %v962_v61 = vpack.c.bf16 %v958_v60, %v957_v59 }
0x1660   :  { %1166 = vmatmul.mubr.msk.bf16.gmra.mxu0 %vm90_vm1, %v962_v61 }
0x16af   :  { %v1045_v6 = vpop.f32.mrf.mxu0 }
0x16b0   :  { %v1046_v9 = vadd.f32 %v1045_v6, %v972_v4 }
0x16b1   :  { %v1047_v7 = vpop.f32.mrf.mxu0 }
0x16b2   :  { %1084 = vst [vmem:[#allocation7] sm:$0xff] %v1046_v9  ;;  %v1048_v8 = vadd.f32 %v1047_v7, %v976_v5 }
0x16b3   :  { %v1049_v19 = vpop.f32.mrf.mxu0 }
0x16b4   :  { %1085 = vst [vmem:[#allocation7 + $0x8] sm:$0xff] %v1048_v8  ;;  %v1050_v10 = vadd.f32 %v1049_v19, %v972_v4 }
0x16b5   :  { %v1051_v13 = vpop.f32.mrf.mxu0 }
0x16b6   :  { %1086 = vst [vmem:[#allocation7 + $0x10] sm:$0xff] %v1050_v10  ;;  %v1052_v14 = vadd.f32 %v1051_v13, %v976_v5 }
0x16b7   :  { %v1055_v35 = vpop.f32.mrf.mxu0 }
0x16b8   :  { %1087 = vst [vmem:[#allocation7 + $0x18] sm:$0xff] %v1052_v14  ;;  %v1056_v16 = vadd.f32 %v1055_v35, %v972_v4 }
0x16b9   :  { %v1057_v17 = vpop.f32.mrf.mxu0 }
0x16ba   :  { %1088 = vst [vmem:[#allocation7 + $0x20] sm:$0xff] %v1056_v16  ;;  %v1058_v18 = vadd.f32 %v1057_v17, %v976_v5 }
0x16bb   :  { %v1059_v20 = vpop.f32.mrf.mxu0 }
0x16bc   :  { %1089 = vst [vmem:[#allocation7 + $0x28] sm:$0xff] %v1058_v18  ;;  %v1060_v22 = vadd.f32 %v1059_v20, %v972_v4 }
0x16bd   :  { %v1061_v21 = vpop.f32.mrf.mxu0 }
0x16be   :  { %1090 = vst [vmem:[#allocation7 + $0x30] sm:$0xff] %v1060_v22  ;;  %v1062_v24 = vadd.f32 %v1061_v21, %v976_v5 }
0x16bf   :  { %v1065_v25 = vpop.f32.mrf.mxu0 }
0x16c0   :  { %1091 = vst [vmem:[#allocation7 + $0x38] sm:$0xff] %v1062_v24  ;;  %v1066_v27 = vadd.f32 %v1065_v25, %v972_v4 }
0x16c1   :  { %v1067_v28 = vpop.f32.mrf.mxu0 }
0x16c2   :  { %1092 = vst [vmem:[#allocation7 + $0x40] sm:$0xff] %v1066_v27  ;;  %v1068_v29 = vadd.f32 %v1067_v28, %v976_v5 }
0x16c3   :  { %v1069_v0 = vpop.f32.mrf.mxu0 }
0x16c4   :  { %1093 = vst [vmem:[#allocation7 + $0x48] sm:$0xff] %v1068_v29  ;;  %v1070_v30 = vadd.f32 %v1069_v0, %v972_v4 }
0x16c5   :  { %v1071_v32 = vpop.f32.mrf.mxu0 }
0x16c6   :  { %1094 = vst [vmem:[#allocation7 + $0x50] sm:$0xff] %v1070_v30  ;;  %v1072_v12 = vadd.f32 %v1071_v32, %v976_v5 }
0x16c8   :  { %1095 = vst [vmem:[#allocation7 + $0x58] sm:$0xff] %v1072_v12 }
0x1720   :  { %v1075_v33 = vpop.f32.mrf.mxu0 }
0x1721   :  { %v1076_v34 = vadd.f32 %v1075_v33, %v972_v4 }
0x1722   :  { %v1077_v36 = vpop.f32.mrf.mxu0 }
0x1723   :  { %1096 = vst [vmem:[#allocation7 + $0x60] sm:$0xff] %v1076_v34  ;;  %v1078_v38 = vadd.f32 %v1077_v36, %v976_v5 }
0x1724   :  { %v1079_v23 = vpop.f32.mrf.mxu0 }
0x1725   :  { %1097 = vst [vmem:[#allocation7 + $0x68] sm:$0xff] %v1078_v38  ;;  %v1080_v37 = vadd.f32 %v1079_v23, %v972_v4 }
0x1726   :  { %v1081_v39 = vpop.f32.mrf.mxu0 }
0x1727   :  { %1098 = vst [vmem:[#allocation7 + $0x70] sm:$0xff] %v1080_v37  ;;  %v1082_v40 = vadd.f32 %v1081_v39, %v976_v5 }
0x1729   :  { %1099 = vst [vmem:[#allocation7 + $0x78] sm:$0xff] %v1082_v40 }
0x172a   :  { %1406 = shalt.err (!%p1403_p9)
}
0x172b   :  { %s1427_s26 = smov 256   ;;  %s1428_s27 = smov 16  }
0x172c   :  { %1111 = dma.vmem_to_hbm [thread:$0]  %s1106_s24, 2048, %s1683_s6, [#allocation6], %s1427_s26, %s1427_s26, %s1428_s27  }
0x172d   :  { %1417 = dma.done.wait [#allocation6], 2048  }
0x172e   :  { %1418 = vsyncadd [#allocation6], 4294965248 }
0x172f   :  { %1115 = vsyncpa [#allocation5], 1 }
0x1730   :  { %1116 = vsyncpa [#allocation6], 1 }

</bundles_post_ra>
